<compile_context>
chip_gen: v7x
topology: tpu7x:2x2x1
jax: 0.10.0
libtpu: 0.0.40
codegen_flags: <defaults>
</compile_context>

<pallas_src>
import functools

import jax
import jax.numpy as jnp
import numpy as np
from jax.experimental import pallas as pl
from jax.experimental.pallas import tpu as pltpu


def _residual_block_kernel(x_ref, w0_ref, b0_ref, w1_ref, b1_ref, mask_ref,
                           out_ref, m_ref, *, W):
    # x_ref / out_ref : (C, B*H*W) f32 in VMEM (lane dim = fused batch*spatial)
    # w*_ref          : (C, 9*C)   f32 in VMEM (tap-major packed 3x3 weights)
    # b*_ref          : (C, 1)     f32 in VMEM
    # mask_ref        : (9, B*H*W) f32 border masks (row 4 == center == ones)
    # m_ref           : (9*C, B*H*W) f32 VMEM scratch (im2col tap matrix)
    C, BHW = x_ref.shape

    x = x_ref[...]                    # read once; reused for the residual add
    masks = mask_ref[...]             # small, stays resident for both convs

    # Static lane-rotation amounts for the 9 taps (dy major, dx minor),
    # matching the (O, kh, kw, I) -> (O, 9I) weight packing (t = kh*3 + kw).
    shifts = []
    for dy in (-1, 0, 1):
        for dx in (-1, 0, 1):
            shifts.append((-(dy * W + dx)) % BHW)

    def conv3x3(h, w_ref, b_ref):
        # Build the (9C, BHW) tap matrix: one XLU roll + one VPU mask-mul per tap.
        for t, shift in enumerate(shifts):
            tap = pltpu.roll(h, shift, axis=1) if shift else h
            if t != 4:                              # center tap needs no mask
                tap = tap * masks[t:t + 1, :]
            m_ref[pl.ds(t * C, C), :] = tap
        # Single MXU matmul does the whole 3x3 channel mix; bias via broadcast add.
        return jnp.dot(w_ref[...], m_ref[...],
                       preferred_element_type=jnp.float32) + b_ref[...]

    h = jnp.maximum(x, 0.0)           # relu
    h = conv3x3(h, w0_ref, b0_ref)    # conv0
    h = jnp.maximum(h, 0.0)           # relu
    h = conv3x3(h, w1_ref, b1_ref)    # conv1
    out_ref[...] = (h + x).astype(out_ref.dtype)   # residual, lane-dense store


def _make_border_masks(H, W, B):
    """(9, B*H*W) f32: mask[t, b*H*W + y*W + x] == 1 iff (y+dy, x+dx) is in-bounds."""
    HW = H * W
    p = np.arange(HW)
    yy, xx = p // W, p % W
    rows = []
    for dy in (-1, 0, 1):
        for dx in (-1, 0, 1):
            valid = ((yy + dy >= 0) & (yy + dy < H) &
                     (xx + dx >= 0) & (xx + dx < W))
            rows.append(np.tile(valid.astype(np.float32), B))
    return np.stack(rows)             # row 4 (center) is all ones


def prepare_residual_block_params(w0, b0, w1, b1):
    """One-time repack of PyTorch OIHW conv params (hoisted out of the hot path)."""
    C = w0.shape[0]
    # (O, I, kh, kw) -> (O, kh, kw, I) -> (O, 9*I);  tap index t = kh*3 + kw.
    w0k = jnp.transpose(w0, (0, 2, 3, 1)).reshape(C, 9 * C)
    w1k = jnp.transpose(w1, (0, 2, 3, 1)).reshape(C, 9 * C)
    return w0k, b0.reshape(C, 1), w1k, b1.reshape(C, 1)


@jax.jit
def residual_block(x_nchw, w0k, b0c, w1k, b1c, masks):
    """x_nchw: (B, C, H, W) f32; packed params from prepare_residual_block_params."""
    B, C, H, W = x_nchw.shape
    BHW = B * H * W
    # Lane-dense layout: channels on sublanes, fused batch*spatial on lanes.
    xt = jnp.transpose(x_nchw, (1, 0, 2, 3)).reshape(C, BHW)

    out = pl.pallas_call(
        functools.partial(_residual_block_kernel, W=W),
        out_shape=jax.ShapeDtypeStruct((C, BHW), x_nchw.dtype),
        in_specs=[pl.BlockSpec(memory_space=pltpu.MemorySpace.VMEM)] * 6,
        out_specs=pl.BlockSpec(memory_space=pltpu.MemorySpace.VMEM),
        scratch_shapes=[pltpu.VMEM((9 * C, BHW), jnp.float32)],
        # Gridless single invocation is right at this (launch-overhead-bound)
        # size; for larger B or H*W use grid=(B,) + dimension_semantics=
        # ("parallel",) so both v7x TensorCores are used and VMEM stays bounded.
    )(xt, w0k, b0c, w1k, b1c, masks)

    return jnp.transpose(out.reshape(C, B, H, W), (1, 0, 2, 3))


def _reference(x, w0, b0, w1, b1):
    dn = ("NCHW", "OIHW", "NCHW")
    h = jax.nn.relu(x)
    h = jax.lax.conv_general_dilated(h, w0, (1, 1), ((1, 1), (1, 1)),
                                     dimension_numbers=dn) + b0[None, :, None, None]
    h = jax.nn.relu(h)
    h = jax.lax.conv_general_dilated(h, w1, (1, 1), ((1, 1), (1, 1)),
                                     dimension_numbers=dn) + b1[None, :, None, None]
    return h + x


if __name__ == "__main__":
    key = jax.random.PRNGKey(0)
    k1, k2, k3, k4, k5 = jax.random.split(key, 5)
    B, C, H, W = 2, 4, 16, 16                      # small shapes consistent with the module
    x = jax.random.normal(k1, (B, C, H, W), jnp.float32)
    # Deterministic synthetic parameters (shapes from nn.Conv2d(C, C, 3, padding=1)).
    w0 = jax.random.normal(k2, (C, C, 3, 3), jnp.float32) * 0.1
    b0 = jax.random.normal(k3, (C,), jnp.float32) * 0.1
    w1 = jax.random.normal(k4, (C, C, 3, 3), jnp.float32) * 0.1
    b1 = jax.random.normal(k5, (C,), jnp.float32) * 0.1

    # One-time parameter / constant prep (hoisted out of the per-call path).
    w0k, b0c, w1k, b1c = prepare_residual_block_params(w0, b0, w1, b1)
    masks = jnp.asarray(_make_border_masks(H, W, B))

    out = residual_block(x, w0k, b0c, w1k, b1c, masks)
    out = jax.block_until_ready(out)

    ref = _reference(x, w0, b0, w1, b1)
    if not np.allclose(np.asarray(out), np.asarray(ref), atol=1e-4, rtol=1e-4):
        raise AssertionError("Pallas ResidualBlock mismatch vs reference")
    print("KERNEL_OK")
</pallas_src>

<mosaic_0001>
module attributes {stable_mosaic.version = 11 : i64} {
  func.func @_residual_block_kernel(%arg0: memref<4x512xf32, #tpu.memory_space<vmem>>, %arg1: memref<4x36xf32, #tpu.memory_space<vmem>>, %arg2: memref<4x1xf32, #tpu.memory_space<vmem>>, %arg3: memref<4x36xf32, #tpu.memory_space<vmem>>, %arg4: memref<4x1xf32, #tpu.memory_space<vmem>>, %arg5: memref<9x512xf32, #tpu.memory_space<vmem>>, %arg6: memref<4x512xf32, #tpu.memory_space<vmem>>, %arg7: memref<36x512xf32, #tpu.memory_space<vmem>>) attributes {dimension_semantics = [], scalar_prefetch = 0 : i64, scratch_operands = 1 : i64, tpu.core_type = #tpu.core_type<tc>} {
    %c0 = arith.constant 0 : index
    %c0_0 = arith.constant 0 : index
    %0 = vector.load %arg0[%c0, %c0_0] : memref<4x512xf32, #tpu.memory_space<vmem>>, vector<4x512xf32>
    %c0_1 = arith.constant 0 : index
    %c0_2 = arith.constant 0 : index
    %1 = vector.load %arg5[%c0_1, %c0_2] : memref<9x512xf32, #tpu.memory_space<vmem>>, vector<9x512xf32>
    %cst = arith.constant 0.000000e+00 : f32
    %2 = vector.broadcast %cst : f32 to vector<4x512xf32>
    %3 = arith.maximumf %0, %2 : vector<4x512xf32>
    %c17_i32 = arith.constant 17 : i32
    %4 = tpu.dynamic_rotate %3 by %c17_i32 dim 1 : vector<4x512xf32>, i32 -> vector<4x512xf32>
    %5 = vector.extract_strided_slice %1 {offsets = [0, 0], sizes = [1, 512], strides = [1, 1]} : vector<9x512xf32> to vector<1x512xf32>
    %6 = vector.broadcast %5 : vector<1x512xf32> to vector<4x512xf32>
    %7 = arith.mulf %4, %6 : vector<4x512xf32>
    %c0_3 = arith.constant 0 : index
    %c0_4 = arith.constant 0 : index
    %8 = vector.load %arg7[%c0_3, %c0_4] : memref<36x512xf32, #tpu.memory_space<vmem>>, vector<4x512xf32>
    tpu.vector_store %arg7[%c0_3, %c0_4], %7 {strides = array<i32>} : memref<36x512xf32, #tpu.memory_space<vmem>>, vector<4x512xf32>,
    %c16_i32 = arith.constant 16 : i32
    %9 = tpu.dynamic_rotate %3 by %c16_i32 dim 1 : vector<4x512xf32>, i32 -> vector<4x512xf32>
    %10 = vector.extract_strided_slice %1 {offsets = [1, 0], sizes = [1, 512], strides = [1, 1]} : vector<9x512xf32> to vector<1x512xf32>
    %11 = vector.broadcast %10 : vector<1x512xf32> to vector<4x512xf32>
    %12 = arith.mulf %9, %11 : vector<4x512xf32>
    %c4 = arith.constant 4 : index
    %c0_5 = arith.constant 0 : index
    %13 = vector.load %arg7[%c4, %c0_5] : memref<36x512xf32, #tpu.memory_space<vmem>>, vector<4x512xf32>
    tpu.vector_store %arg7[%c4, %c0_5], %12 {strides = array<i32>} : memref<36x512xf32, #tpu.memory_space<vmem>>, vector<4x512xf32>,
    %c15_i32 = arith.constant 15 : i32
    %14 = tpu.dynamic_rotate %3 by %c15_i32 dim 1 : vector<4x512xf32>, i32 -> vector<4x512xf32>
    %15 = vector.extract_strided_slice %1 {offsets = [2, 0], sizes = [1, 512], strides = [1, 1]} : vector<9x512xf32> to vector<1x512xf32>
    %16 = vector.broadcast %15 : vector<1x512xf32> to vector<4x512xf32>
    %17 = arith.mulf %14, %16 : vector<4x512xf32>
    %c8 = arith.constant 8 : index
    %c0_6 = arith.constant 0 : index
    %18 = vector.load %arg7[%c8, %c0_6] : memref<36x512xf32, #tpu.memory_space<vmem>>, vector<4x512xf32>
    tpu.vector_store %arg7[%c8, %c0_6], %17 {strides = array<i32>} : memref<36x512xf32, #tpu.memory_space<vmem>>, vector<4x512xf32>,
    %c1_i32 = arith.constant 1 : i32
    %19 = tpu.dynamic_rotate %3 by %c1_i32 dim 1 : vector<4x512xf32>, i32 -> vector<4x512xf32>
    %20 = vector.extract_strided_slice %1 {offsets = [3, 0], sizes = [1, 512], strides = [1, 1]} : vector<9x512xf32> to vector<1x512xf32>
    %21 = vector.broadcast %20 : vector<1x512xf32> to vector<4x512xf32>
    %22 = arith.mulf %19, %21 : vector<4x512xf32>
    %c12 = arith.constant 12 : index
    %c0_7 = arith.constant 0 : index
    %23 = vector.load %arg7[%c12, %c0_7] : memref<36x512xf32, #tpu.memory_space<vmem>>, vector<4x512xf32>
    tpu.vector_store %arg7[%c12, %c0_7], %22 {strides = array<i32>} : memref<36x512xf32, #tpu.memory_space<vmem>>, vector<4x512xf32>,
    %c16 = arith.constant 16 : index
    %c0_8 = arith.constant 0 : index
    %24 = vector.load %arg7[%c16, %c0_8] : memref<36x512xf32, #tpu.memory_space<vmem>>, vector<4x512xf32>
    tpu.vector_store %arg7[%c16, %c0_8], %3 {strides = array<i32>} : memref<36x512xf32, #tpu.memory_space<vmem>>, vector<4x512xf32>,
    %c511_i32 = arith.constant 511 : i32
    %25 = tpu.dynamic_rotate %3 by %c511_i32 dim 1 : vector<4x512xf32>, i32 -> vector<4x512xf32>
    %26 = vector.extract_strided_slice %1 {offsets = [5, 0], sizes = [1, 512], strides = [1, 1]} : vector<9x512xf32> to vector<1x512xf32>
    %27 = vector.broadcast %26 : vector<1x512xf32> to vector<4x512xf32>
    %28 = arith.mulf %25, %27 : vector<4x512xf32>
    %c20 = arith.constant 20 : index
    %c0_9 = arith.constant 0 : index
    %29 = vector.load %arg7[%c20, %c0_9] : memref<36x512xf32, #tpu.memory_space<vmem>>, vector<4x512xf32>
    tpu.vector_store %arg7[%c20, %c0_9], %28 {strides = array<i32>} : memref<36x512xf32, #tpu.memory_space<vmem>>, vector<4x512xf32>,
    %c497_i32 = arith.constant 497 : i32
    %30 = tpu.dynamic_rotate %3 by %c497_i32 dim 1 : vector<4x512xf32>, i32 -> vector<4x512xf32>
    %31 = vector.extract_strided_slice %1 {offsets = [6, 0], sizes = [1, 512], strides = [1, 1]} : vector<9x512xf32> to vector<1x512xf32>
    %32 = vector.broadcast %31 : vector<1x512xf32> to vector<4x512xf32>
    %33 = arith.mulf %30, %32 : vector<4x512xf32>
    %c24 = arith.constant 24 : index
    %c0_10 = arith.constant 0 : index
    %34 = vector.load %arg7[%c24, %c0_10] : memref<36x512xf32, #tpu.memory_space<vmem>>, vector<4x512xf32>
    tpu.vector_store %arg7[%c24, %c0_10], %33 {strides = array<i32>} : memref<36x512xf32, #tpu.memory_space<vmem>>, vector<4x512xf32>,
    %c496_i32 = arith.constant 496 : i32
    %35 = tpu.dynamic_rotate %3 by %c496_i32 dim 1 : vector<4x512xf32>, i32 -> vector<4x512xf32>
    %36 = vector.extract_strided_slice %1 {offsets = [7, 0], sizes = [1, 512], strides = [1, 1]} : vector<9x512xf32> to vector<1x512xf32>
    %37 = vector.broadcast %36 : vector<1x512xf32> to vector<4x512xf32>
    %38 = arith.mulf %35, %37 : vector<4x512xf32>
    %c28 = arith.constant 28 : index
    %c0_11 = arith.constant 0 : index
    %39 = vector.load %arg7[%c28, %c0_11] : memref<36x512xf32, #tpu.memory_space<vmem>>, vector<4x512xf32>
    tpu.vector_store %arg7[%c28, %c0_11], %38 {strides = array<i32>} : memref<36x512xf32, #tpu.memory_space<vmem>>, vector<4x512xf32>,
    %c495_i32 = arith.constant 495 : i32
    %40 = tpu.dynamic_rotate %3 by %c495_i32 dim 1 : vector<4x512xf32>, i32 -> vector<4x512xf32>
    %41 = vector.extract_strided_slice %1 {offsets = [8, 0], sizes = [1, 512], strides = [1, 1]} : vector<9x512xf32> to vector<1x512xf32>
    %42 = vector.broadcast %41 : vector<1x512xf32> to vector<4x512xf32>
    %43 = arith.mulf %40, %42 : vector<4x512xf32>
    %c32 = arith.constant 32 : index
    %c0_12 = arith.constant 0 : index
    %44 = vector.load %arg7[%c32, %c0_12] : memref<36x512xf32, #tpu.memory_space<vmem>>, vector<4x512xf32>
    tpu.vector_store %arg7[%c32, %c0_12], %43 {strides = array<i32>} : memref<36x512xf32, #tpu.memory_space<vmem>>, vector<4x512xf32>,
    %c0_13 = arith.constant 0 : index
    %c0_14 = arith.constant 0 : index
    %45 = vector.load %arg1[%c0_13, %c0_14] : memref<4x36xf32, #tpu.memory_space<vmem>>, vector<4x36xf32>
    %c0_15 = arith.constant 0 : index
    %c0_16 = arith.constant 0 : index
    %46 = vector.load %arg7[%c0_15, %c0_16] : memref<36x512xf32, #tpu.memory_space<vmem>>, vector<36x512xf32>
    %cst_17 = arith.constant dense<0.000000e+00> : vector<4x512xf32>
    %47 = tpu.matmul %45, %46, %cst_17 {dimension_numbers = #tpu.dot_dimension_numbers<[1], [0], [0], [1], [0, 0, 1, 1], [], []>} : vector<4x36xf32>, vector<36x512xf32>, vector<4x512xf32> -> vector<4x512xf32>
    %c0_18 = arith.constant 0 : index
    %c0_19 = arith.constant 0 : index
    %48 = vector.load %arg2[%c0_18, %c0_19] : memref<4x1xf32, #tpu.memory_space<vmem>>, vector<4x1xf32>
    %49 = vector.broadcast %48 : vector<4x1xf32> to vector<4x512xf32>
    %50 = arith.addf %47, %49 : vector<4x512xf32>
    %cst_20 = arith.constant 0.000000e+00 : f32
    %51 = vector.broadcast %cst_20 : f32 to vector<4x512xf32>
    %52 = arith.maximumf %50, %51 : vector<4x512xf32>
    %c17_i32_21 = arith.constant 17 : i32
    %53 = tpu.dynamic_rotate %52 by %c17_i32_21 dim 1 : vector<4x512xf32>, i32 -> vector<4x512xf32>
    %54 = vector.extract_strided_slice %1 {offsets = [0, 0], sizes = [1, 512], strides = [1, 1]} : vector<9x512xf32> to vector<1x512xf32>
    %55 = vector.broadcast %54 : vector<1x512xf32> to vector<4x512xf32>
    %56 = arith.mulf %53, %55 : vector<4x512xf32>
    %c0_22 = arith.constant 0 : index
    %c0_23 = arith.constant 0 : index
    %57 = vector.load %arg7[%c0_22, %c0_23] : memref<36x512xf32, #tpu.memory_space<vmem>>, vector<4x512xf32>
    tpu.vector_store %arg7[%c0_22, %c0_23], %56 {strides = array<i32>} : memref<36x512xf32, #tpu.memory_space<vmem>>, vector<4x512xf32>,
    %c16_i32_24 = arith.constant 16 : i32
    %58 = tpu.dynamic_rotate %52 by %c16_i32_24 dim 1 : vector<4x512xf32>, i32 -> vector<4x512xf32>
    %59 = vector.extract_strided_slice %1 {offsets = [1, 0], sizes = [1, 512], strides = [1, 1]} : vector<9x512xf32> to vector<1x512xf32>
    %60 = vector.broadcast %59 : vector<1x512xf32> to vector<4x512xf32>
    %61 = arith.mulf %58, %60 : vector<4x512xf32>
    %c4_25 = arith.constant 4 : index
    %c0_26 = arith.constant 0 : index
    %62 = vector.load %arg7[%c4_25, %c0_26] : memref<36x512xf32, #tpu.memory_space<vmem>>, vector<4x512xf32>
    tpu.vector_store %arg7[%c4_25, %c0_26], %61 {strides = array<i32>} : memref<36x512xf32, #tpu.memory_space<vmem>>, vector<4x512xf32>,
    %c15_i32_27 = arith.constant 15 : i32
    %63 = tpu.dynamic_rotate %52 by %c15_i32_27 dim 1 : vector<4x512xf32>, i32 -> vector<4x512xf32>
    %64 = vector.extract_strided_slice %1 {offsets = [2, 0], sizes = [1, 512], strides = [1, 1]} : vector<9x512xf32> to vector<1x512xf32>
    %65 = vector.broadcast %64 : vector<1x512xf32> to vector<4x512xf32>
    %66 = arith.mulf %63, %65 : vector<4x512xf32>
    %c8_28 = arith.constant 8 : index
    %c0_29 = arith.constant 0 : index
    %67 = vector.load %arg7[%c8_28, %c0_29] : memref<36x512xf32, #tpu.memory_space<vmem>>, vector<4x512xf32>
    tpu.vector_store %arg7[%c8_28, %c0_29], %66 {strides = array<i32>} : memref<36x512xf32, #tpu.memory_space<vmem>>, vector<4x512xf32>,
    %c1_i32_30 = arith.constant 1 : i32
    %68 = tpu.dynamic_rotate %52 by %c1_i32_30 dim 1 : vector<4x512xf32>, i32 -> vector<4x512xf32>
    %69 = vector.extract_strided_slice %1 {offsets = [3, 0], sizes = [1, 512], strides = [1, 1]} : vector<9x512xf32> to vector<1x512xf32>
    %70 = vector.broadcast %69 : vector<1x512xf32> to vector<4x512xf32>
    %71 = arith.mulf %68, %70 : vector<4x512xf32>
    %c12_31 = arith.constant 12 : index
    %c0_32 = arith.constant 0 : index
    %72 = vector.load %arg7[%c12_31, %c0_32] : memref<36x512xf32, #tpu.memory_space<vmem>>, vector<4x512xf32>
    tpu.vector_store %arg7[%c12_31, %c0_32], %71 {strides = array<i32>} : memref<36x512xf32, #tpu.memory_space<vmem>>, vector<4x512xf32>,
    %c16_33 = arith.constant 16 : index
    %c0_34 = arith.constant 0 : index
    %73 = vector.load %arg7[%c16_33, %c0_34] : memref<36x512xf32, #tpu.memory_space<vmem>>, vector<4x512xf32>
    tpu.vector_store %arg7[%c16_33, %c0_34], %52 {strides = array<i32>} : memref<36x512xf32, #tpu.memory_space<vmem>>, vector<4x512xf32>,
    %c511_i32_35 = arith.constant 511 : i32
    %74 = tpu.dynamic_rotate %52 by %c511_i32_35 dim 1 : vector<4x512xf32>, i32 -> vector<4x512xf32>
    %75 = vector.extract_strided_slice %1 {offsets = [5, 0], sizes = [1, 512], strides = [1, 1]} : vector<9x512xf32> to vector<1x512xf32>
    %76 = vector.broadcast %75 : vector<1x512xf32> to vector<4x512xf32>
    %77 = arith.mulf %74, %76 : vector<4x512xf32>
    %c20_36 = arith.constant 20 : index
    %c0_37 = arith.constant 0 : index
    %78 = vector.load %arg7[%c20_36, %c0_37] : memref<36x512xf32, #tpu.memory_space<vmem>>, vector<4x512xf32>
    tpu.vector_store %arg7[%c20_36, %c0_37], %77 {strides = array<i32>} : memref<36x512xf32, #tpu.memory_space<vmem>>, vector<4x512xf32>,
    %c497_i32_38 = arith.constant 497 : i32
    %79 = tpu.dynamic_rotate %52 by %c497_i32_38 dim 1 : vector<4x512xf32>, i32 -> vector<4x512xf32>
    %80 = vector.extract_strided_slice %1 {offsets = [6, 0], sizes = [1, 512], strides = [1, 1]} : vector<9x512xf32> to vector<1x512xf32>
    %81 = vector.broadcast %80 : vector<1x512xf32> to vector<4x512xf32>
    %82 = arith.mulf %79, %81 : vector<4x512xf32>
    %c24_39 = arith.constant 24 : index
    %c0_40 = arith.constant 0 : index
    %83 = vector.load %arg7[%c24_39, %c0_40] : memref<36x512xf32, #tpu.memory_space<vmem>>, vector<4x512xf32>
    tpu.vector_store %arg7[%c24_39, %c0_40], %82 {strides = array<i32>} : memref<36x512xf32, #tpu.memory_space<vmem>>, vector<4x512xf32>,
    %c496_i32_41 = arith.constant 496 : i32
    %84 = tpu.dynamic_rotate %52 by %c496_i32_41 dim 1 : vector<4x512xf32>, i32 -> vector<4x512xf32>
    %85 = vector.extract_strided_slice %1 {offsets = [7, 0], sizes = [1, 512], strides = [1, 1]} : vector<9x512xf32> to vector<1x512xf32>
    %86 = vector.broadcast %85 : vector<1x512xf32> to vector<4x512xf32>
    %87 = arith.mulf %84, %86 : vector<4x512xf32>
    %c28_42 = arith.constant 28 : index
    %c0_43 = arith.constant 0 : index
    %88 = vector.load %arg7[%c28_42, %c0_43] : memref<36x512xf32, #tpu.memory_space<vmem>>, vector<4x512xf32>
    tpu.vector_store %arg7[%c28_42, %c0_43], %87 {strides = array<i32>} : memref<36x512xf32, #tpu.memory_space<vmem>>, vector<4x512xf32>,
    %c495_i32_44 = arith.constant 495 : i32
    %89 = tpu.dynamic_rotate %52 by %c495_i32_44 dim 1 : vector<4x512xf32>, i32 -> vector<4x512xf32>
    %90 = vector.extract_strided_slice %1 {offsets = [8, 0], sizes = [1, 512], strides = [1, 1]} : vector<9x512xf32> to vector<1x512xf32>
    %91 = vector.broadcast %90 : vector<1x512xf32> to vector<4x512xf32>
    %92 = arith.mulf %89, %91 : vector<4x512xf32>
    %c32_45 = arith.constant 32 : index
    %c0_46 = arith.constant 0 : index
    %93 = vector.load %arg7[%c32_45, %c0_46] : memref<36x512xf32, #tpu.memory_space<vmem>>, vector<4x512xf32>
    tpu.vector_store %arg7[%c32_45, %c0_46], %92 {strides = array<i32>} : memref<36x512xf32, #tpu.memory_space<vmem>>, vector<4x512xf32>,
    %c0_47 = arith.constant 0 : index
    %c0_48 = arith.constant 0 : index
    %94 = vector.load %arg3[%c0_47, %c0_48] : memref<4x36xf32, #tpu.memory_space<vmem>>, vector<4x36xf32>
    %c0_49 = arith.constant 0 : index
    %c0_50 = arith.constant 0 : index
    %95 = vector.load %arg7[%c0_49, %c0_50] : memref<36x512xf32, #tpu.memory_space<vmem>>, vector<36x512xf32>
    %cst_51 = arith.constant dense<0.000000e+00> : vector<4x512xf32>
    %96 = tpu.matmul %94, %95, %cst_51 {dimension_numbers = #tpu.dot_dimension_numbers<[1], [0], [0], [1], [0, 0, 1, 1], [], []>} : vector<4x36xf32>, vector<36x512xf32>, vector<4x512xf32> -> vector<4x512xf32>
    %c0_52 = arith.constant 0 : index
    %c0_53 = arith.constant 0 : index
    %97 = vector.load %arg4[%c0_52, %c0_53] : memref<4x1xf32, #tpu.memory_space<vmem>>, vector<4x1xf32>
    %98 = vector.broadcast %97 : vector<4x1xf32> to vector<4x512xf32>
    %99 = arith.addf %96, %98 : vector<4x512xf32>
    %100 = arith.addf %99, %0 : vector<4x512xf32>
    %c0_54 = arith.constant 0 : index
    %c0_55 = arith.constant 0 : index
    %101 = vector.load %arg6[%c0_54, %c0_55] : memref<4x512xf32, #tpu.memory_space<vmem>>, vector<4x512xf32>
    tpu.vector_store %arg6[%c0_54, %c0_55], %100 {strides = array<i32>} : memref<4x512xf32, #tpu.memory_space<vmem>>, vector<4x512xf32>,
    return
  }
}

</mosaic_0001>

<bundles_post_ra>
// kernel: residual_block.1
= control target key start
LH: loop header
LB: loop body
LE: loop exit
PB: predicated region body
PF: predicated region fallthrough
CT: control target
= control target key end

     0   :  { %s1064_s25 = smov 16   ;;  %s1065_s26 = smov 1   ;;  %v1072_v6 = vmov 0.0   ;;  %v1073_v8 = vmov 0   ;;  %v49_v9 = vlaneseq  ;;  %vm422_vm8 = vcmask 1043456   ;;  %s1554_s0 = inlined_call_operand.vmem [shape: f32[4,512], index: 0, kind: input, shape index: {}]   ;;  %s1555_s2 = inlined_call_operand.vmem [shape: f32[4,1], index: 2, kind: input, shape index: {}]   ;;  %s1556_s5 = inlined_call_operand.vmem [shape: f32[9,512], index: 5, kind: input, shape index: {}]   ;;  %s1557_s1 = inlined_call_operand.vmem [shape: f32[4,36], index: 1, kind: input, shape index: {}]   ;;  %s1558_s4 = inlined_call_operand.vmem [shape: f32[4,1], index: 4, kind: input, shape index: {}]   ;;  %s1559_s3 = inlined_call_operand.vmem [shape: f32[4,36], index: 3, kind: input, shape index: {}]   ;;  %s1560_s6 = inlined_call_operand.vmem [shape: f32[4,512], index: 6, kind: output, shape index: {}]  }
   0x1   :  { %v24_v0 = vld [vmem:[%s1554_s0 + $0x8] sm:$0xff]  ;;  %v23_v1 = vld [vmem:[%s1554_s0] sm:$0xff]  ;;  %s1066_s27 = smov 17   ;;  %s1067_s28 = smov 15   ;;  %499 = vmatprep.mubr.f32.mxu0 %v1072_v6  ;;  %570 = vmatprep.mubr.f32.mxu1 %v1072_v6  ;;  %v1165_v14 = vld [vmem:[%s1556_s5 + $0x18] sm:$0xff]  ;;  %vm418_vm9 = vcmask 293888  }
   0x2   :  { %v34_v2 = vmax.f32 %v24_v0, 0.0  ;;  %v33_v3 = vmax.f32 %v23_v1, 0.0  ;;  %s1068_s29 = smov 127   ;;  %s1069_s30 = smov 112   ;;  %v412_v7 = vld [vmem:[%s1555_s2] sm:$0xf]  ;;  %1059 = vset.pattern.permute.xlu0 %v1073_v8 }
   0x3   :  { %s1070_s7 = smov 113   ;;  %s1071_s8 = smov 111   ;;  %v1152_v10 = vshrl.u32 %v49_v9, 7  ;;  %v1154_v11 = vand.u32 127, %v49_v9  ;;  %v1159_v12 = vld [vmem:[%s1556_s5] sm:$0xff]  ;;  %v1170_v15 = vld [vmem:[%s1556_s5 + $0x8] sm:$0xff] }
   0x4   :  { %84 = vrot.lane.b32.xlu1 %v34_v2, %s1064_s25  ;;  %217 = vst [vmem:[#allocation2 + $0x50] sm:$0xf] %v34_v2  ;;  %80 = vrot.lane.b32.xlu0 %v33_v3, %s1064_s25  ;;  %215 = vst [vmem:[#allocation2 + $0x40] sm:$0xf] %v33_v3  ;;  %v38_v4 = vcombine.high %v34_v2, %v34_v2  ;;  %v37_v5 = vcombine.high %v33_v3, %v33_v3  ;;  %v1175_v16 = vld [vmem:[%s1556_s5 + $0x10] sm:$0xff] }
   0x5   :  { %v95_v13 = vsub.s32 1, %v1152_v10  ;;  %v181_v19 = vsub.s32 3, %v1152_v10  ;;  %vm88_vm0 = vcmp.lt.s32.totalorder %v1154_v11, 16  ;;  %vm174_vm1 = vcmp.lt.s32.totalorder %v1154_v11, 1 }
   0x6   :  { %218 = vst [vmem:[#allocation2 + $0x58] sm:$0xf] %v38_v4  ;;  %216 = vst [vmem:[#allocation2 + $0x48] sm:$0xf] %v37_v5  ;;  %v58_v42 = vsub.s32 0, %v1152_v10  ;;  %vm51_vm2 = vcmp.lt.s32.totalorder %v1154_v11, 17 }
   0x7   :  { %v1180_v20 = vrot.slane %v1159_v12, %v95_v13  ;;  %v1183_v21 = vrot.slane %v1165_v14, %v95_v13  ;;  %v1186_v22 = vrot.slane %v1170_v15, %v95_v13  ;;  %v1189_v23 = vrot.slane %v1175_v16, %v95_v13 }
   0x8   :  { %86 = vrot.lane.b32.xlu1 %v38_v4, %s1064_s25  ;;  %82 = vrot.lane.b32.xlu0 %v37_v5, %s1064_s25  ;;  %v1193_v26 = vrot.slane %v1170_v15, %v181_v19  ;;  %v1212_v44 = vrot.slane %v1159_v12, %v181_v19  ;;  %v1215_v45 = vrot.slane %v1175_v16, %v181_v19  ;;  %vm137_vm3 = vcmp.lt.s32.totalorder %v1154_v11, 15 }
   0x9   :  { %v1218_v46 = vrot.slane %v1165_v14, %v181_v19  ;;  %v1231_v56 = vrot.slane %v1170_v15, %v58_v42  ;;  %v1236_v63 = vrot.slane %v1159_v12, %v58_v42  ;;  %v1240_v1 = vrot.slane %v1175_v16, %v58_v42 }
   0xa   :  { %vm227_vm4 = vcmp.lt.s32.totalorder %v1154_v11, 127  ;;  %vm313_vm5 = vcmp.lt.s32.totalorder %v1154_v11, 112  ;;  %vm276_vm6 = vcmp.lt.s32.totalorder %v1154_v11, 113  ;;  %vm362_vm7 = vcmp.lt.s32.totalorder %v1154_v11, 111  ;;  %v793_v11 = vld [vmem:[%s1559_s3] sm:$0xf] }
   0xc   :  { %168 = vrot.lane.b32.xlu1 %v37_v5, %s1065_s26  ;;  %166 = vrot.lane.b32.xlu0 %v33_v3, %s1065_s26 }
  0x10   :  { %172 = vrot.lane.b32.xlu1 %v38_v4, %s1065_s26  ;;  %170 = vrot.lane.b32.xlu0 %v34_v2, %s1065_s26 }
  0x14   :  { %43 = vrot.lane.b32.xlu1 %v37_v5, %s1066_s27  ;;  %41 = vrot.lane.b32.xlu0 %v33_v3, %s1066_s27 }
  0x18   :  { %47 = vrot.lane.b32.xlu1 %v38_v4, %s1066_s27  ;;  %45 = vrot.lane.b32.xlu0 %v34_v2, %s1066_s27 }
  0x1c   :  { %131 = vrot.lane.b32.xlu1 %v37_v5, %s1067_s28  ;;  %129 = vrot.lane.b32.xlu0 %v33_v3, %s1067_s28 }
  0x20   :  { %135 = vrot.lane.b32.xlu1 %v38_v4, %s1067_s28  ;;  %133 = vrot.lane.b32.xlu0 %v34_v2, %s1067_s28 }
  0x24   :  { %221 = vrot.lane.b32.xlu1 %v37_v5, %s1068_s29  ;;  %219 = vrot.lane.b32.xlu0 %v33_v3, %s1068_s29 }
  0x28   :  { %225 = vrot.lane.b32.xlu1 %v38_v4, %s1068_s29  ;;  %223 = vrot.lane.b32.xlu0 %v34_v2, %s1068_s29 }
  0x2c   :  { %307 = vrot.lane.b32.xlu1 %v37_v5, %s1069_s30  ;;  %305 = vrot.lane.b32.xlu0 %v33_v3, %s1069_s30 }
  0x30   :  { %311 = vrot.lane.b32.xlu1 %v38_v4, %s1069_s30  ;;  %309 = vrot.lane.b32.xlu0 %v34_v2, %s1069_s30 }
  0x34   :  { %270 = vrot.lane.b32.xlu1 %v37_v5, %s1070_s7  ;;  %268 = vrot.lane.b32.xlu0 %v33_v3, %s1070_s7 }
  0x38   :  { %274 = vrot.lane.b32.xlu1 %v38_v4, %s1070_s7  ;;  %272 = vrot.lane.b32.xlu0 %v34_v2, %s1070_s7 }
  0x3c   :  { %356 = vrot.lane.b32.xlu1 %v37_v5, %s1071_s8  ;;  %354 = vrot.lane.b32.xlu0 %v33_v3, %s1071_s8  ;;  %v144_v3 = vsub.s32 2, %v1152_v10 }
  0x3e   :  { %v1257_v19 = vrot.slane %v1170_v15, %v144_v3 }
  0x40   :  { %360 = vrot.lane.b32.xlu1 %v38_v4, %s1071_s8  ;;  %358 = vrot.lane.b32.xlu0 %v34_v2, %s1071_s8  ;;  %v1243_v2 = vrot.slane %v1165_v14, %v58_v42 }
  0x44   :  { %415 = vperm.xlu0 %1059, %v412_v7  }
  0x76   :  { %v85_v17 = vpop.permute.xlu1 %84  ;;  %v81_v18 = vpop.permute.xlu0 %80 }
  0x7a   :  { %v87_v24 = vpop.permute.xlu1 %86  ;;  %v83_v25 = vpop.permute.xlu0 %82 }
  0x7b   :  { %v89_v27 = vsel %vm88_vm0, %v85_v17, %v87_v24  ;;  %v92_v28 = vsel %vm88_vm0, %v87_v24, %v81_v18  ;;  %v90_v29 = vsel %vm88_vm0, %v83_v25, %v85_v17  ;;  %v91_v30 = vsel %vm88_vm0, %v81_v18, %v83_v25 }
  0x7c   :  { %v109_v31 = vmul.f32 %v1180_v20, %v92_v28  ;;  %v112_v32 = vmul.f32 %v1183_v21, %v89_v27  ;;  %v110_v33 = vmul.f32 %v1186_v22, %v91_v30  ;;  %v111_v34 = vmul.f32 %v1189_v23, %v90_v29 }
  0x7d   :  { %v1262_v28 = vrot.slane %v1159_v12, %v144_v3  ;;  %v1266_v30 = vrot.slane %v1175_v16, %v144_v3 }
  0x7e   :  { %v117_v35 = vrot.slane %v109_v31, 4  ;;  %v120_v36 = vrot.slane %v112_v32, 4  ;;  %v118_v37 = vrot.slane %v110_v33, 4  ;;  %v119_v38 = vrot.slane %v111_v34, 4  ;;  %v169_v39 = vpop.permute.xlu1 %168  ;;  %v167_v40 = vpop.permute.xlu0 %166 }
  0x7f   :  { %v177_v41 = vsel %vm174_vm1, %v167_v40, %v169_v39  ;;  %v1269_v31 = vrot.slane %v1165_v14, %v144_v3  ;;  %v234_v32 = vsub.s32 5, %v1152_v10 }
  0x80   :  { %125 = vst [vmem:[#allocation2] sm:$0xf0] %v117_v35  ;;  %128 = vst [vmem:[#allocation2 + $0x18] sm:$0xf0] %v120_v36  ;;  %v196_v43 = vmul.f32 %v1193_v26, %v177_v41 }
  0x81   :  { %126 = vst [vmem:[#allocation2 + $0x8] sm:$0xf0] %v118_v37  ;;  %127 = vst [vmem:[#allocation2 + $0x10] sm:$0xf0] %v119_v38  ;;  %v1283_v41 = vrot.slane %v1159_v12, %v234_v32 }
  0x82   :  { %v204_v47 = vrot.slane %v196_v43, 4  ;;  %v173_v48 = vpop.permute.xlu1 %172  ;;  %v171_v49 = vpop.permute.xlu0 %170 }
  0x83   :  { %v178_v50 = vsel %vm174_vm1, %v173_v48, %v167_v40  ;;  %v175_v51 = vsel %vm174_vm1, %v171_v49, %v173_v48  ;;  %v176_v52 = vsel %vm174_vm1, %v169_v39, %v171_v49  ;;  %v1288_v48 = vrot.slane %v1165_v14, %v234_v32 }
  0x84   :  { %212 = vst [vmem:[#allocation2 + $0x28] sm:$0xf0] %v204_v47  ;;  %v195_v53 = vmul.f32 %v1212_v44, %v178_v50  ;;  %v197_v54 = vmul.f32 %v1215_v45, %v176_v52  ;;  %v198_v55 = vmul.f32 %v1218_v46, %v175_v51  ;;  %v1292_v50 = vrot.slane %v1170_v15, %v234_v32 }
  0x85   :  { %v1295_v51 = vrot.slane %v1175_v16, %v234_v32  ;;  %v320_v52 = vsub.s32 7, %v1152_v10 }
  0x86   :  { %v203_v57 = vrot.slane %v195_v53, 4  ;;  %v205_v58 = vrot.slane %v197_v54, 4  ;;  %v206_v59 = vrot.slane %v198_v55, 4  ;;  %v44_v60 = vpop.permute.xlu1 %43  ;;  %v42_v61 = vpop.permute.xlu0 %41 }
  0x87   :  { %v54_v62 = vsel %vm51_vm2, %v42_v61, %v44_v60 }
  0x88   :  { %211 = vst [vmem:[#allocation2 + $0x20] sm:$0xf0] %v203_v57  ;;  %213 = vst [vmem:[#allocation2 + $0x30] sm:$0xf0] %v205_v58  ;;  %v73_v0 = vmul.f32 %v1231_v56, %v54_v62 }
  0x89   :  { %214 = vst [vmem:[#allocation2 + $0x38] sm:$0xf0] %v206_v59 }
  0x8a   :  { %77 = vst [vmem:[#allocation2 + $0x8] sm:$0xf] %v73_v0  ;;  %v48_v4 = vpop.permute.xlu1 %47  ;;  %v46_v5 = vpop.permute.xlu0 %45 }
  0x8b   :  { %v55_v7 = vsel %vm51_vm2, %v48_v4, %v42_v61  ;;  %v52_v8 = vsel %vm51_vm2, %v46_v5, %v48_v4  ;;  %v53_v9 = vsel %vm51_vm2, %v44_v60, %v46_v5  ;;  %v1309_v5 = vrot.slane %v1159_v12, %v320_v52 }
  0x8c   :  { %v72_v13 = vmul.f32 %v1236_v63, %v55_v7  ;;  %v74_v17 = vmul.f32 %v1240_v1, %v53_v9  ;;  %v75_v18 = vmul.f32 %v1243_v2, %v52_v8 }
  0x8e   :  { %76 = vst [vmem:[#allocation2] sm:$0xf] %v72_v13  ;;  %78 = vst [vmem:[#allocation2 + $0x10] sm:$0xf] %v74_v17  ;;  %v132_v24 = vpop.permute.xlu1 %131  ;;  %v130_v25 = vpop.permute.xlu0 %129 }
  0x8f   :  { %79 = vst [vmem:[#allocation2 + $0x18] sm:$0xf] %v75_v18  ;;  %v140_v27 = vsel %vm137_vm3, %v130_v25, %v132_v24 }
  0x90   :  { %v159_v29 = vmul.f32 %v1257_v19, %v140_v27 }
  0x91   :  { %v393_v53 = vld [vmem:[#allocation2 + $0x8] sm:$0xff] }
  0x92   :  { %163 = vst [vmem:[#allocation2 + $0x28] sm:$0xf] %v159_v29  ;;  %v136_v33 = vpop.permute.xlu1 %135  ;;  %v134_v34 = vpop.permute.xlu0 %133 }
  0x93   :  { %v141_v35 = vsel %vm137_vm3, %v136_v33, %v130_v25  ;;  %v138_v36 = vsel %vm137_vm3, %v134_v34, %v136_v33  ;;  %v139_v37 = vsel %vm137_vm3, %v132_v24, %v134_v34 }
  0x94   :  { %v158_v38 = vmul.f32 %v1262_v28, %v141_v35  ;;  %v160_v39 = vmul.f32 %v1266_v30, %v139_v37  ;;  %v161_v40 = vmul.f32 %v1269_v31, %v138_v36  ;;  %v1314_v37 = vrot.slane %v1165_v14, %v320_v52 }
  0x95   :  { %v392_v7 = vld [vmem:[#allocation2] sm:$0xff]  ;;  %v394_v33 = vld [vmem:[#allocation2 + $0x10] sm:$0xff] }
  0x96   :  { %162 = vst [vmem:[#allocation2 + $0x20] sm:$0xf] %v158_v38  ;;  %164 = vst [vmem:[#allocation2 + $0x30] sm:$0xf] %v160_v39  ;;  %v222_v42 = vpop.permute.xlu1 %221  ;;  %v220_v43 = vpop.permute.xlu0 %219  ;;  %v395_v32 = vld [vmem:[#allocation2 + $0x18] sm:$0xff]  ;;  %v1318_v39 = vrot.slane %v1170_v15, %v320_v52 }
  0x97   :  { %165 = vst [vmem:[#allocation2 + $0x38] sm:$0xf] %v161_v40  ;;  %v230_v47 = vsel %vm227_vm4, %v220_v43, %v222_v42  ;;  %v1321_v40 = vrot.slane %v1175_v16, %v320_v52 }
  0x98   :  { %v248_v49 = vmul.f32 %v1283_v41, %v230_v47 }
  0x99   :  { %v397_v54 = vld [vmem:[#allocation2 + $0x28] sm:$0xff] }
  0x9a   :  { %v256_v55 = vrot.slane %v248_v49, 4  ;;  %v226_v57 = vpop.permute.xlu1 %225  ;;  %v224_v58 = vpop.permute.xlu0 %223  ;;  %v1017_v59 = vpack.c.bf16 %v397_v54, %v393_v53 }
  0x9b   :  { %v231_v60 = vsel %vm227_vm4, %v226_v57, %v220_v43  ;;  %v228_v61 = vsel %vm227_vm4, %v224_v58, %v226_v57  ;;  %v229_v62 = vsel %vm227_vm4, %v222_v42, %v224_v58  ;;  %v283_v42 = vsub.s32 6, %v1152_v10 }
  0x9c   :  { %264 = vst [vmem:[#allocation2 + $0x40] sm:$0xf0] %v256_v55  ;;  %v251_v0 = vmul.f32 %v1288_v48, %v231_v60  ;;  %v249_v3 = vmul.f32 %v1292_v50, %v229_v62  ;;  %v250_v4 = vmul.f32 %v1295_v51, %v228_v61  ;;  %1018 = vmatprep.subr.bf16.mxu0 %v1017_v59 }
  0x9d   :  { %v396_v8 = vld [vmem:[#allocation2 + $0x20] sm:$0xff]  ;;  %v398_v13 = vld [vmem:[#allocation2 + $0x30] sm:$0xff]  ;;  %v1335_v58 = vrot.slane %v1159_v12, %v283_v42  ;;  %v1347_v12 = vrot.slane %v1175_v16, %v283_v42 }
  0x9e   :  { %v399_v9 = vld [vmem:[#allocation2 + $0x38] sm:$0xff]  ;;  %v259_v17 = vrot.slane %v251_v0, 4  ;;  %v257_v18 = vrot.slane %v249_v3, 4  ;;  %v258_v24 = vrot.slane %v250_v4, 4  ;;  %v308_v25 = vpop.permute.xlu1 %307  ;;  %v306_v27 = vpop.permute.xlu0 %305  ;;  %v1019_v29 = vpack.c.bf16 %v396_v8, %v392_v7  ;;  %v1362_v16 = vld [vmem:[%s1556_s5 + $0x20] ss:$0 sm:$0xff] }
  0x9f   :  { %v316_v34 = vsel %vm313_vm5, %v306_v27, %v308_v25  ;;  %v1025_v35 = vpack.c.bf16 %v399_v9, %v395_v32  ;;  %v1027_v36 = vpack.c.bf16 %v398_v13, %v394_v33  ;;  %v1341_v7 = vrot.slane %v1165_v14, %v283_v42 }
  0xa0   :  { %267 = vst [vmem:[#allocation2 + $0x58] sm:$0xf0] %v259_v17  ;;  %265 = vst [vmem:[#allocation2 + $0x48] sm:$0xf0] %v257_v18  ;;  %v334_v38 = vmul.f32 %v1309_v5, %v316_v34  ;;  %1020 = vmatpush1.bf16.msra.mxu0 %v1019_v29  ;;  %v1344_v8 = vrot.slane %v1170_v15, %v283_v42  ;;  %v1370_v34 = vld [vmem:[%s1556_s5 + $0x38] ss:$0 sm:$0xff] }
  0xa1   :  { %266 = vst [vmem:[#allocation2 + $0x50] sm:$0xf0] %v258_v24  ;;  %1026 = vmatprep.subr.bf16.mxu1 %v1025_v35  ;;  %v1375_v35 = vld [vmem:[%s1556_s5 + $0x28] ss:$0 sm:$0xff] }
  0xa2   :  { %v342_v43 = vrot.slane %v334_v38, 4  ;;  %1028 = vmatpush1.bf16.msra.mxu1 %v1027_v36  ;;  %v312_v47 = vpop.permute.xlu1 %311  ;;  %v310_v49 = vpop.permute.xlu0 %309  ;;  %v1380_v36 = vld [vmem:[%s1556_s5 + $0x30] ss:$0 sm:$0xff] }
  0xa3   :  { %v317_v53 = vsel %vm313_vm5, %v312_v47, %v306_v27  ;;  %v314_v54 = vsel %vm313_vm5, %v310_v49, %v312_v47  ;;  %v315_v55 = vsel %vm313_vm5, %v308_v25, %v310_v49 }
  0xa4   :  { %350 = vst [vmem:[#allocation2 + $0x60] sm:$0xf0] %v342_v43  ;;  %v337_v52 = vmul.f32 %v1314_v37, %v317_v53  ;;  %v335_v10 = vmul.f32 %v1318_v39, %v315_v55  ;;  %v336_v57 = vmul.f32 %v1321_v40, %v314_v54 }
  0xa6   :  { %v345_v59 = vrot.slane %v337_v52, 4  ;;  %v343_v60 = vrot.slane %v335_v10, 4  ;;  %v344_v61 = vrot.slane %v336_v57, 4  ;;  %v271_v62 = vpop.permute.xlu1 %270  ;;  %v269_v0 = vpop.permute.xlu0 %268 }
  0xa7   :  { %v279_v3 = vsel %vm276_vm6, %v269_v0, %v271_v62  ;;  %v401_v53 = vld [vmem:[#allocation2 + $0x48] sm:$0xff]  ;;  %v403_v10 = vld [vmem:[#allocation2 + $0x58] sm:$0xff] }
  0xa8   :  { %353 = vst [vmem:[#allocation2 + $0x78] sm:$0xf0] %v345_v59  ;;  %351 = vst [vmem:[#allocation2 + $0x68] sm:$0xf0] %v343_v60  ;;  %v297_v4 = vmul.f32 %v1335_v58, %v279_v3  ;;  %v402_v59 = vld [vmem:[#allocation2 + $0x50] sm:$0xff] }
  0xa9   :  { %352 = vst [vmem:[#allocation2 + $0x70] sm:$0xf0] %v344_v61 }
  0xaa   :  { %301 = vst [vmem:[#allocation2 + $0x60] sm:$0xf] %v297_v4  ;;  %v275_v9 = vpop.permute.xlu1 %274  ;;  %v273_v13 = vpop.permute.xlu0 %272  ;;  %v400_v4 = vld [vmem:[#allocation2 + $0x40] sm:$0xff] }
  0xab   :  { %v280_v17 = vsel %vm276_vm6, %v275_v9, %v269_v0  ;;  %v277_v18 = vsel %vm276_vm6, %v273_v13, %v275_v9  ;;  %v278_v24 = vsel %vm276_vm6, %v271_v62, %v273_v13 }
  0xac   :  { %v300_v14 = vmul.f32 %v1341_v7, %v280_v17  ;;  %v298_v15 = vmul.f32 %v1344_v8, %v278_v24  ;;  %v299_v25 = vmul.f32 %v1347_v12, %v277_v18  ;;  %v391_v17 = vld [vmem:[%s1557_s1] sm:$0xf] }
  0xae   :  { %304 = vst [vmem:[#allocation2 + $0x78] sm:$0xf] %v300_v14  ;;  %302 = vst [vmem:[#allocation2 + $0x68] sm:$0xf] %v298_v15  ;;  %v357_v27 = vpop.permute.xlu1 %356  ;;  %v355_v29 = vpop.permute.xlu0 %354 }
  0xaf   :  { %303 = vst [vmem:[#allocation2 + $0x70] sm:$0xf] %v299_v25  ;;  %v365_v32 = vsel %vm362_vm7, %v355_v29, %v357_v27 }
  0xb0   :  { %v383_v33 = vmul.f32 %v1362_v16, %v365_v32 }
  0xb1   :  { %v404_v57 = vld [vmem:[#allocation2 + $0x60] sm:$0xff] }
  0xb2   :  { %387 = vst [vmem:[#allocation2 + $0x80] sm:$0xf] %v383_v33  ;;  %v361_v38 = vpop.permute.xlu1 %360  ;;  %v359_v42 = vpop.permute.xlu0 %358  ;;  %v1023_v13 = vpack.c.bf16 %v404_v57, %v400_v4 }
  0xb3   :  { %v366_v43 = vsel %vm362_vm7, %v361_v38, %v355_v29  ;;  %v363_v47 = vsel %vm362_vm7, %v359_v42, %v361_v38  ;;  %v364_v49 = vsel %vm362_vm7, %v357_v27, %v359_v42 }
  0xb4   :  { %v386_v54 = vmul.f32 %v1370_v34, %v366_v43  ;;  %v384_v55 = vmul.f32 %v1375_v35, %v364_v49  ;;  %v385_v52 = vmul.f32 %v1380_v36, %v363_v47 }
  0xb5   :  { %v405_v60 = vld [vmem:[#allocation2 + $0x68] sm:$0xff]  ;;  %v407_v61 = vld [vmem:[#allocation2 + $0x78] sm:$0xff] }
  0xb6   :  { %v406_v62 = vld [vmem:[#allocation2 + $0x70] sm:$0xff]  ;;  %390 = vst [vmem:[#allocation2 + $0x98] sm:$0xf] %v386_v54  ;;  %388 = vst [vmem:[#allocation2 + $0x88] sm:$0xf] %v384_v55  ;;  %v1021_v0 = vpack.c.bf16 %v405_v60, %v401_v53  ;;  %v1029_v3 = vpack.c.bf16 %v407_v61, %v403_v10 }
  0xb7   :  { %389 = vst [vmem:[#allocation2 + $0x90] sm:$0xf] %v385_v52  ;;  %v1031_v9 = vpack.c.bf16 %v406_v62, %v402_v59 }
  0xb8   :  { %1022 = vmatprep.subr.bf16.mxu0 %v1021_v0  ;;  %1030 = vmatprep.subr.bf16.mxu1 %v1029_v3 }
  0xb9   :  { %1024 = vmatpush1.bf16.msra.mxu0 %v1023_v13  ;;  %1032 = vmatpush1.bf16.msra.mxu1 %v1031_v9  ;;  %v408_v15 = vld [vmem:[#allocation2 + $0x80] sm:$0xf] }
  0xbd   :  { %v409_v18 = vld [vmem:[#allocation2 + $0x88] sm:$0xf]  ;;  %v411_v24 = vld [vmem:[#allocation2 + $0x98] sm:$0xf] }
  0xbe   :  { %v410_v14 = vld [vmem:[#allocation2 + $0x90] sm:$0xf]  ;;  %1005 = vmatprep.subr.msk.mxu0 %vm422_vm8, %v409_v18  ;;  %1008 = vmatprep.subr.msk.mxu1 %vm422_vm8, %v411_v24 }
  0xbf   :  { %1006 = vmatpush1.msk.msra.mxu0 %vm422_vm8, %v408_v15  ;;  %1009 = vmatpush1.msk.msra.mxu1 %vm422_vm8, %v410_v14 }
  0xc0   :  { %1007 = vmatmul.mubr.msk.f32.vlgmr.msra.gmra.mrb[0].mxu0 %vm418_vm9, %v391_v17  ;;  %1010 = vmatmul.mubr.msk.f32.vlgmr.msra.gmra.mrb[0].mxu1 %vm418_vm9, %v391_v17 }
  0xc1   :  { %899 = vmatprep.mubr.f32.mxu0 %v1072_v6  ;;  %970 = vmatprep.mubr.f32.mxu1 %v1072_v6  ;;  %v814_v6 = vld [vmem:[%s1558_s4] sm:$0xf] }
  0xc3   :  { %v416_v25 = vpop.permute.xlu0 %415 }
 0x193   :  { %v572_v27 = vpop.f32.mrb[0].mxu1  ;;  %v501_v29 = vpop.f32.mrb[0].mxu0 }
 0x194   :  { %v573_v32 = vadd.f32 %v572_v27, %v416_v25  ;;  %v502_v33 = vadd.f32 %v501_v29, %v416_v25  ;;  %v503_v38 = vpop.f32.mrb[1].mxu0  ;;  %v574_v42 = vpop.f32.mrb[1].mxu1 }
 0x195   :  { %v504_v43 = vadd.f32 %v503_v38, %v416_v25  ;;  %v575_v47 = vadd.f32 %v574_v42, %v416_v25 }
 0x196   :  { %v579_v49 = vmax.f32 %v573_v32, 0.0  ;;  %v577_v53 = vmax.f32 %v502_v33, 0.0 }
 0x197   :  { %v578_v54 = vmax.f32 %v504_v43, 0.0  ;;  %v580_v55 = vmax.f32 %v575_v47, 0.0 }
 0x198   :  { %687 = vst [vmem:[#allocation2 + $0x50] sm:$0xf] %v579_v49  ;;  %685 = vst [vmem:[#allocation2 + $0x40] sm:$0xf] %v577_v53  ;;  %605 = vrot.lane.b32.xlu0 %v579_v49, %s1064_s25  ;;  %601 = vrot.lane.b32.xlu1 %v577_v53, %s1064_s25 }
 0x199   :  { %686 = vst [vmem:[#allocation2 + $0x48] sm:$0xf] %v578_v54  ;;  %688 = vst [vmem:[#allocation2 + $0x58] sm:$0xf] %v580_v55 }
 0x19c   :  { %653 = vrot.lane.b32.xlu0 %v577_v53, %s1065_s26  ;;  %603 = vrot.lane.b32.xlu1 %v578_v54, %s1064_s25 }
 0x1a0   :  { %657 = vrot.lane.b32.xlu0 %v579_v49, %s1065_s26  ;;  %607 = vrot.lane.b32.xlu1 %v580_v55, %s1064_s25 }
 0x1a4   :  { %581 = vrot.lane.b32.xlu0 %v577_v53, %s1066_s27  ;;  %655 = vrot.lane.b32.xlu1 %v578_v54, %s1065_s26 }
 0x1a8   :  { %585 = vrot.lane.b32.xlu0 %v579_v49, %s1066_s27  ;;  %659 = vrot.lane.b32.xlu1 %v580_v55, %s1065_s26 }
 0x1ac   :  { %633 = vrot.lane.b32.xlu0 %v577_v53, %s1067_s28  ;;  %583 = vrot.lane.b32.xlu1 %v578_v54, %s1066_s27 }
 0x1b0   :  { %637 = vrot.lane.b32.xlu0 %v579_v49, %s1067_s28  ;;  %587 = vrot.lane.b32.xlu1 %v580_v55, %s1066_s27 }
 0x1b4   :  { %689 = vrot.lane.b32.xlu0 %v577_v53, %s1068_s29  ;;  %635 = vrot.lane.b32.xlu1 %v578_v54, %s1067_s28 }
 0x1b8   :  { %693 = vrot.lane.b32.xlu0 %v579_v49, %s1068_s29  ;;  %639 = vrot.lane.b32.xlu1 %v580_v55, %s1067_s28 }
 0x1bc   :  { %741 = vrot.lane.b32.xlu0 %v577_v53, %s1069_s30  ;;  %691 = vrot.lane.b32.xlu1 %v578_v54, %s1068_s29 }
 0x1c0   :  { %745 = vrot.lane.b32.xlu0 %v579_v49, %s1069_s30  ;;  %695 = vrot.lane.b32.xlu1 %v580_v55, %s1068_s29 }
 0x1c4   :  { %721 = vrot.lane.b32.xlu0 %v577_v53, %s1070_s7  ;;  %743 = vrot.lane.b32.xlu1 %v578_v54, %s1069_s30 }
 0x1c8   :  { %725 = vrot.lane.b32.xlu0 %v579_v49, %s1070_s7  ;;  %747 = vrot.lane.b32.xlu1 %v580_v55, %s1069_s30 }
 0x1cc   :  { %773 = vrot.lane.b32.xlu0 %v577_v53, %s1071_s8  ;;  %723 = vrot.lane.b32.xlu1 %v578_v54, %s1070_s7 }
 0x1d0   :  { %777 = vrot.lane.b32.xlu0 %v579_v49, %s1071_s8  ;;  %727 = vrot.lane.b32.xlu1 %v580_v55, %s1070_s7 }
 0x1d4   :  { %817 = vperm.xlu0 %1059, %v814_v6   ;;  %775 = vrot.lane.b32.xlu1 %v578_v54, %s1071_s8 }
 0x1d8   :  { %779 = vrot.lane.b32.xlu1 %v580_v55, %s1071_s8 }
 0x20a   :  { %v606_v52 = vpop.permute.xlu0 %605  ;;  %v602_v10 = vpop.permute.xlu1 %601 }
 0x20e   :  { %v654_v57 = vpop.permute.xlu0 %653  ;;  %v604_v59 = vpop.permute.xlu1 %603 }
 0x20f   :  { %v610_v60 = vsel %vm88_vm0, %v604_v59, %v606_v52  ;;  %v611_v61 = vsel %vm88_vm0, %v602_v10, %v604_v59 }
 0x210   :  { %v614_v62 = vmul.f32 %v611_v61, %v1186_v22  ;;  %v615_v0 = vmul.f32 %v610_v60, %v1189_v23 }
 0x212   :  { %v622_v3 = vrot.slane %v614_v62, 4  ;;  %v623_v4 = vrot.slane %v615_v0, 4  ;;  %v658_v9 = vpop.permute.xlu0 %657  ;;  %v608_v13 = vpop.permute.xlu1 %607 }
 0x213   :  { %v609_v17 = vsel %vm88_vm0, %v606_v52, %v608_v13  ;;  %v612_v18 = vsel %vm88_vm0, %v608_v13, %v602_v10 }
 0x214   :  { %630 = vst [vmem:[#allocation2 + $0x8] sm:$0xf0] %v622_v3  ;;  %631 = vst [vmem:[#allocation2 + $0x10] sm:$0xf0] %v623_v4  ;;  %v613_v24 = vmul.f32 %v612_v18, %v1180_v20  ;;  %v616_v14 = vmul.f32 %v609_v17, %v1183_v21 }
 0x216   :  { %v621_v15 = vrot.slane %v613_v24, 4  ;;  %v624_v22 = vrot.slane %v616_v14, 4  ;;  %v582_v25 = vpop.permute.xlu0 %581  ;;  %v656_v23 = vpop.permute.xlu1 %655 }
 0x217   :  { %v662_v27 = vsel %vm174_vm1, %v656_v23, %v658_v9  ;;  %v663_v29 = vsel %vm174_vm1, %v654_v57, %v656_v23 }
 0x218   :  { %629 = vst [vmem:[#allocation2] sm:$0xf0] %v621_v15  ;;  %632 = vst [vmem:[#allocation2 + $0x18] sm:$0xf0] %v624_v22  ;;  %v666_v32 = vmul.f32 %v663_v29, %v1193_v26  ;;  %v667_v33 = vmul.f32 %v662_v27, %v1215_v45 }
 0x21a   :  { %v674_v38 = vrot.slane %v666_v32, 4  ;;  %v675_v20 = vrot.slane %v667_v33, 4  ;;  %v586_v42 = vpop.permute.xlu0 %585  ;;  %v660_v21 = vpop.permute.xlu1 %659 }
 0x21b   :  { %v661_v43 = vsel %vm174_vm1, %v658_v9, %v660_v21  ;;  %v664_v47 = vsel %vm174_vm1, %v660_v21, %v654_v57 }
 0x21c   :  { %682 = vst [vmem:[#allocation2 + $0x28] sm:$0xf0] %v674_v38  ;;  %683 = vst [vmem:[#allocation2 + $0x30] sm:$0xf0] %v675_v20  ;;  %v665_v49 = vmul.f32 %v664_v47, %v1212_v44  ;;  %v668_v53 = vmul.f32 %v661_v43, %v1218_v46 }
 0x21e   :  { %v673_v54 = vrot.slane %v665_v49, 4  ;;  %v676_v26 = vrot.slane %v668_v53, 4  ;;  %v634_v55 = vpop.permute.xlu0 %633  ;;  %v584_v45 = vpop.permute.xlu1 %583 }
 0x21f   :  { %v590_v6 = vsel %vm51_vm2, %v584_v45, %v586_v42  ;;  %v591_v52 = vsel %vm51_vm2, %v582_v25, %v584_v45 }
 0x220   :  { %681 = vst [vmem:[#allocation2 + $0x20] sm:$0xf0] %v673_v54  ;;  %684 = vst [vmem:[#allocation2 + $0x38] sm:$0xf0] %v676_v26  ;;  %v594_v10 = vmul.f32 %v591_v52, %v1231_v56  ;;  %v595_v57 = vmul.f32 %v590_v6, %v1240_v1 }
 0x222   :  { %598 = vst [vmem:[#allocation2 + $0x8] sm:$0xf] %v594_v10  ;;  %599 = vst [vmem:[#allocation2 + $0x10] sm:$0xf] %v595_v57  ;;  %v638_v44 = vpop.permute.xlu0 %637  ;;  %v588_v46 = vpop.permute.xlu1 %587 }
 0x223   :  { %v589_v59 = vsel %vm51_vm2, %v586_v42, %v588_v46  ;;  %v592_v60 = vsel %vm51_vm2, %v588_v46, %v582_v25 }
 0x224   :  { %v593_v61 = vmul.f32 %v592_v60, %v1236_v63  ;;  %v596_v62 = vmul.f32 %v589_v59, %v1243_v2 }
 0x226   :  { %597 = vst [vmem:[#allocation2] sm:$0xf] %v593_v61  ;;  %600 = vst [vmem:[#allocation2 + $0x18] sm:$0xf] %v596_v62  ;;  %v690_v0 = vpop.permute.xlu0 %689  ;;  %v636_v56 = vpop.permute.xlu1 %635 }
 0x227   :  { %v642_v1 = vsel %vm137_vm3, %v636_v56, %v638_v44  ;;  %v643_v3 = vsel %vm137_vm3, %v634_v55, %v636_v56 }
 0x228   :  { %v646_v4 = vmul.f32 %v643_v3, %v1257_v19  ;;  %v647_v9 = vmul.f32 %v642_v1, %v1266_v30 }
 0x229   :  { %v795_v23 = vld [vmem:[#allocation2 + $0x8] sm:$0xff]  ;;  %v796_v52 = vld [vmem:[#allocation2 + $0x10] sm:$0xff] }
 0x22a   :  { %650 = vst [vmem:[#allocation2 + $0x28] sm:$0xf] %v646_v4  ;;  %651 = vst [vmem:[#allocation2 + $0x30] sm:$0xf] %v647_v9  ;;  %v694_v13 = vpop.permute.xlu0 %693  ;;  %v640_v63 = vpop.permute.xlu1 %639 }
 0x22b   :  { %v641_v2 = vsel %vm137_vm3, %v638_v44, %v640_v63  ;;  %v644_v17 = vsel %vm137_vm3, %v640_v63, %v634_v55 }
 0x22c   :  { %v645_v18 = vmul.f32 %v644_v17, %v1262_v28  ;;  %v648_v24 = vmul.f32 %v641_v2, %v1269_v31 }
 0x22d   :  { %v797_v47 = vld [vmem:[#allocation2 + $0x18] sm:$0xff] }
 0x22e   :  { %649 = vst [vmem:[#allocation2 + $0x20] sm:$0xf] %v645_v18  ;;  %652 = vst [vmem:[#allocation2 + $0x38] sm:$0xf] %v648_v24  ;;  %v742_v14 = vpop.permute.xlu0 %741  ;;  %v692_v19 = vpop.permute.xlu1 %691 }
 0x22f   :  { %v698_v30 = vsel %vm227_vm4, %v692_v19, %v694_v13  ;;  %v699_v15 = vsel %vm227_vm4, %v690_v0, %v692_v19 }
 0x230   :  { %v701_v22 = vmul.f32 %v699_v15, %v1283_v41  ;;  %v702_v25 = vmul.f32 %v698_v30, %v1292_v50  ;;  %v794_v50 = vld [vmem:[#allocation2] sm:$0xff] }
 0x231   :  { %v799_v27 = vld [vmem:[#allocation2 + $0x28] sm:$0xff]  ;;  %v800_v21 = vld [vmem:[#allocation2 + $0x30] sm:$0xff] }
 0x232   :  { %v709_v29 = vrot.slane %v701_v22, 4  ;;  %v710_v28 = vrot.slane %v702_v25, 4  ;;  %v746_v32 = vpop.permute.xlu0 %745  ;;  %v696_v31 = vpop.permute.xlu1 %695  ;;  %v1033_v33 = vpack.c.bf16 %v799_v27, %v795_v23 }
 0x233   :  { %v697_v38 = vsel %vm227_vm4, %v694_v13, %v696_v31  ;;  %v700_v20 = vsel %vm227_vm4, %v696_v31, %v690_v0 }
 0x234   :  { %717 = vst [vmem:[#allocation2 + $0x40] sm:$0xf0] %v709_v29  ;;  %718 = vst [vmem:[#allocation2 + $0x48] sm:$0xf0] %v710_v28  ;;  %v703_v42 = vmul.f32 %v697_v38, %v1295_v51  ;;  %v704_v41 = vmul.f32 %v700_v20, %v1288_v48  ;;  %1034 = vmatprep.subr.bf16.mxu0 %v1033_v33  ;;  %v1043_v48 = vpack.c.bf16 %v800_v21, %v796_v52 }
 0x235   :  { %v798_v43 = vld [vmem:[#allocation2 + $0x20] sm:$0xff]  ;;  %v801_v49 = vld [vmem:[#allocation2 + $0x38] sm:$0xff] }
 0x236   :  { %v711_v53 = vrot.slane %v703_v42, 4  ;;  %v712_v54 = vrot.slane %v704_v41, 4  ;;  %v722_v26 = vpop.permute.xlu0 %721  ;;  %v744_v55 = vpop.permute.xlu1 %743  ;;  %v1035_v45 = vpack.c.bf16 %v798_v43, %v794_v50  ;;  %v1041_v6 = vpack.c.bf16 %v801_v49, %v797_v47  ;;  %v1062_v49 = vld [vmem:[%s1554_s0] sm:$0xff] }
 0x237   :  { %v750_v10 = vsel %vm313_vm5, %v744_v55, %v746_v32  ;;  %v751_v51 = vsel %vm313_vm5, %v742_v14, %v744_v55 }
 0x238   :  { %719 = vst [vmem:[#allocation2 + $0x50] sm:$0xf0] %v711_v53  ;;  %720 = vst [vmem:[#allocation2 + $0x58] sm:$0xf0] %v712_v54  ;;  %v753_v57 = vmul.f32 %v751_v51, %v1309_v5  ;;  %v754_v44 = vmul.f32 %v750_v10, %v1318_v39  ;;  %1036 = vmatpush1.bf16.msra.mxu0 %v1035_v45  ;;  %1042 = vmatprep.subr.bf16.mxu1 %v1041_v6  ;;  %v1063_v10 = vld [vmem:[%s1554_s0 + $0x8] sm:$0xff] }
 0x239   :  { %1044 = vmatpush1.bf16.msra.mxu1 %v1043_v48  ;;  %v979_v53 = vcombine.high %v1062_v49, %v1062_v49  ;;  %v980_v51 = vcombine.high %v1063_v10, %v1063_v10 }
 0x23a   :  { %v761_v46 = vrot.slane %v753_v57, 4  ;;  %v762_v59 = vrot.slane %v754_v44, 4  ;;  %v726_v60 = vpop.permute.xlu0 %725  ;;  %v748_v61 = vpop.permute.xlu1 %747 }
 0x23b   :  { %v749_v62 = vsel %vm313_vm5, %v746_v32, %v748_v61  ;;  %v752_v0 = vsel %vm313_vm5, %v748_v61, %v742_v14  ;;  %v803_v22 = vld [vmem:[#allocation2 + $0x48] sm:$0xff]  ;;  %v802_v23 = vld [vmem:[#allocation2 + $0x40] sm:$0xff] }
 0x23c   :  { %769 = vst [vmem:[#allocation2 + $0x60] sm:$0xf0] %v761_v46  ;;  %770 = vst [vmem:[#allocation2 + $0x68] sm:$0xf0] %v762_v59  ;;  %v755_v56 = vmul.f32 %v749_v62, %v1321_v40  ;;  %v756_v5 = vmul.f32 %v752_v0, %v1314_v37 }
 0x23e   :  { %v763_v39 = vrot.slane %v755_v56, 4  ;;  %v764_v1 = vrot.slane %v756_v5, 4  ;;  %v724_v3 = vpop.permute.xlu1 %723  ;;  %v774_v13 = vpop.permute.xlu0 %773 }
 0x23f   :  { %v730_v4 = vsel %vm276_vm6, %v724_v3, %v726_v60  ;;  %v731_v9 = vsel %vm276_vm6, %v722_v26, %v724_v3  ;;  %v804_v38 = vld [vmem:[#allocation2 + $0x50] sm:$0xff] }
 0x240   :  { %771 = vst [vmem:[#allocation2 + $0x70] sm:$0xf0] %v763_v39  ;;  %772 = vst [vmem:[#allocation2 + $0x78] sm:$0xf0] %v764_v1  ;;  %v733_v63 = vmul.f32 %v731_v9, %v1335_v58  ;;  %v734_v2 = vmul.f32 %v730_v4, %v1344_v8 }
 0x242   :  { %737 = vst [vmem:[#allocation2 + $0x60] sm:$0xf] %v733_v63  ;;  %738 = vst [vmem:[#allocation2 + $0x68] sm:$0xf] %v734_v2  ;;  %v728_v40 = vpop.permute.xlu1 %727  ;;  %v778_v14 = vpop.permute.xlu0 %777 }
 0x243   :  { %v729_v37 = vsel %vm276_vm6, %v726_v60, %v728_v40  ;;  %v732_v17 = vsel %vm276_vm6, %v728_v40, %v722_v26 }
 0x244   :  { %v735_v18 = vmul.f32 %v729_v37, %v1347_v12  ;;  %v736_v24 = vmul.f32 %v732_v17, %v1341_v7 }
 0x246   :  { %739 = vst [vmem:[#allocation2 + $0x70] sm:$0xf] %v735_v18  ;;  %740 = vst [vmem:[#allocation2 + $0x78] sm:$0xf] %v736_v24  ;;  %v776_v19 = vpop.permute.xlu1 %775 }
 0x247   :  { %v782_v58 = vsel %vm362_vm7, %v776_v19, %v778_v14  ;;  %v783_v8 = vsel %vm362_vm7, %v774_v13, %v776_v19 }
 0x248   :  { %v785_v30 = vmul.f32 %v1362_v16, %v783_v8  ;;  %v786_v15 = vmul.f32 %v1375_v35, %v782_v58  ;;  %v805_v35 = vld [vmem:[#allocation2 + $0x58] sm:$0xff] }
 0x249   :  { %v807_v25 = vld [vmem:[#allocation2 + $0x68] sm:$0xff]  ;;  %v806_v12 = vld [vmem:[#allocation2 + $0x60] sm:$0xff] }
 0x24a   :  { %789 = vst [vmem:[#allocation2 + $0x80] sm:$0xf] %v785_v30  ;;  %790 = vst [vmem:[#allocation2 + $0x88] sm:$0xf] %v786_v15  ;;  %v780_v7 = vpop.permute.xlu1 %779  ;;  %v1037_v27 = vpack.c.bf16 %v807_v25, %v803_v22  ;;  %v1039_v29 = vpack.c.bf16 %v806_v12, %v802_v23 }
 0x24b   :  { %v781_v28 = vsel %vm362_vm7, %v778_v14, %v780_v7  ;;  %v784_v32 = vsel %vm362_vm7, %v780_v7, %v774_v13 }
 0x24c   :  { %v787_v31 = vmul.f32 %v1380_v36, %v781_v28  ;;  %v788_v16 = vmul.f32 %v1370_v34, %v784_v32  ;;  %1038 = vmatprep.subr.bf16.mxu0 %v1037_v27 }
 0x24d   :  { %1040 = vmatpush1.bf16.msra.mxu0 %v1039_v29  ;;  %v809_v33 = vld [vmem:[#allocation2 + $0x78] sm:$0xff]  ;;  %v808_v20 = vld [vmem:[#allocation2 + $0x70] sm:$0xff] }
 0x24e   :  { %791 = vst [vmem:[#allocation2 + $0x90] sm:$0xf] %v787_v31  ;;  %792 = vst [vmem:[#allocation2 + $0x98] sm:$0xf] %v788_v16  ;;  %v1045_v42 = vpack.c.bf16 %v809_v33, %v805_v35  ;;  %v1047_v41 = vpack.c.bf16 %v808_v20, %v804_v38 }
 0x250   :  { %1046 = vmatprep.subr.bf16.mxu1 %v1045_v42 }
 0x251   :  { %1048 = vmatpush1.bf16.msra.mxu1 %v1047_v41  ;;  %v811_v50 = vld [vmem:[#allocation2 + $0x88] sm:$0xf]  ;;  %v810_v21 = vld [vmem:[#allocation2 + $0x80] sm:$0xf] }
 0x252   :  { %1011 = vmatprep.subr.msk.mxu0 %vm422_vm8, %v811_v50 }
 0x253   :  { %1012 = vmatpush1.msk.msra.mxu0 %vm422_vm8, %v810_v21  ;;  %v818_v43 = vpop.permute.xlu0 %817 }
 0x254   :  { %1013 = vmatmul.mubr.msk.f32.vlgmr.msra.gmra.mrb[2].mxu0 %vm418_vm9, %v793_v11 }
 0x255   :  { %v813_v34 = vld [vmem:[#allocation2 + $0x98] sm:$0xf]  ;;  %v812_v36 = vld [vmem:[#allocation2 + $0x90] sm:$0xf] }
 0x256   :  { %1014 = vmatprep.subr.msk.mxu1 %vm422_vm8, %v813_v34 }
 0x257   :  { %1015 = vmatpush1.msk.msra.mxu1 %vm422_vm8, %v812_v36 }
 0x258   :  { %1016 = vmatmul.mubr.msk.f32.vlgmr.msra.gmra.mrb[2].mxu1 %vm418_vm9, %v793_v11 }
 0x327   :  { %v901_v47 = vpop.f32.mrb[2].mxu0 }
 0x328   :  { %v902_v54 = vadd.f32 %v901_v47, %v818_v43  ;;  %v903_v26 = vpop.f32.mrb[3].mxu0 }
 0x329   :  { %v904_v55 = vadd.f32 %v903_v26, %v818_v43 }
 0x32a   :  { %v983_v45 = vadd.f32 %v1062_v49, %v902_v54 }
 0x32b   :  { %v984_v6 = vadd.f32 %v979_v53, %v904_v55  ;;  %v972_v52 = vpop.f32.mrb[2].mxu1 }
 0x32c   :  { %v973_v48 = vadd.f32 %v972_v52, %v818_v43  ;;  %v974_v57 = vpop.f32.mrb[3].mxu1 }
 0x32d   :  { %v991_v44 = vcombine.low %v983_v45, %v984_v6  ;;  %v975_v46 = vadd.f32 %v974_v57, %v818_v43 }
 0x32e   :  { %v985_v59 = vadd.f32 %v1063_v10, %v973_v48 }
 0x32f   :  { %995 = vst [vmem:[%s1560_s6] sm:$0xff] %v991_v44  ;;  %v986_v60 = vadd.f32 %v980_v51, %v975_v46 }
 0x331   :  { %v992_v61 = vcombine.low %v985_v59, %v986_v60 }
 0x333   :  { %996 = vst [vmem:[%s1560_s6 + $0x8] sm:$0xff] %v992_v61 }

</bundles_post_ra>
